<compile_context>
chip_gen: v6e
topology: v6e:2x2x1
jax: 0.10.0
libtpu: 0.0.40
codegen_flags: <defaults>
</compile_context>

<pallas_src>
import jax
import jax.numpy as jnp
from jax.experimental import pallas as pl
from jax.experimental.pallas import tpu as pltpu

_LANES = 128


def identity(x):
    """The optimal Identity: no kernel, no HBM traffic."""
    return x


def _identity_kernel(x_ref, o_ref):
    # Pure pass-through of the current VMEM tile; fully hidden under the DMAs.
    o_ref[...] = x_ref[...]


def _round_up(v, m):
    return ((v + m - 1) // m) * m


def _num_tensorcores():
    """Best-effort TensorCore-per-chip count (v7x has 2, v5e/v6e have 1)."""
    try:
        dev = jax.devices()[0]
        if dev.platform != "tpu":
            return 1
        for attr in ("num_cores", "core_count"):
            n = getattr(dev, attr, None)
            if isinstance(n, int) and n >= 1:
                return n
    except Exception:
        pass
    return 1


def identity_pallas(x):
    """Identity forward pass via a Pallas copy kernel.

    Documented per review: this can never beat `identity(x)`; it exists only
    to exercise a Pallas path.  Falls back to the true no-op when no
    pad-free lane-dense 2D view of the flat data exists.
    """
    orig_shape = x.shape
    total = x.size
    if total == 0:
        return x

    itemsize = jnp.dtype(x.dtype).itemsize
    # Dtype-aware sublane alignment: sub-32-bit dtypes pack rows along sublanes.
    sub_align = {4: 8, 2: 16, 1: 32}.get(itemsize, 8)

    # Widest lane-dense column count (multiple of 128) dividing the flat
    # length exactly, preferring factorizations with sublane-aligned rows.
    n_cols = None
    for cand in (2048, 1024, 512, 256, _LANES):
        if total % cand == 0 and (total // cand) % sub_align == 0:
            n_cols = cand
            break
    if n_cols is None:
        for cand in (2048, 1024, 512, 256, _LANES):
            if total % cand == 0:
                n_cols = cand
                break
    if n_cols is None:
        # Padding + slicing would double HBM traffic for a pure copy; the
        # optimal Identity for these shapes is the no-op.
        return x

    n_rows = total // n_cols
    x2d = x.reshape(n_rows, n_cols)  # contiguous row-major reshape: free

    # ~4 MiB blocks (perf review): amortizes the ~0.35 us/step grid overhead
    # while keeping scoped VMEM at 4 MiB * 2 bufs * 2 arrays = 16 MiB.
    target_block_bytes = 4 * 1024 * 1024
    row_bytes = n_cols * itemsize
    tile_rows = max(sub_align,
                    (target_block_bytes // row_bytes) // sub_align * sub_align)
    tile_rows = min(tile_rows, _round_up(n_rows, sub_align))

    # Multi-TC chips (v7x): give the grid a multiple-of-num_tc step count so
    # both cores get equal work.  Single-TC chips (v5e/v6e): never force a
    # split -- extra steps there are pure overhead.
    num_tc = _num_tensorcores()
    if num_tc > 1 and n_rows > sub_align:
        steps = max(pl.cdiv(n_rows, tile_rows), num_tc)
        steps = _round_up(steps, num_tc)
        tile_rows = _round_up(pl.cdiv(n_rows, steps), sub_align)

    grid = (pl.cdiv(n_rows, tile_rows),)  # partial last block is masked

    out2d = pl.pallas_call(
        _identity_kernel,
        out_shape=jax.ShapeDtypeStruct((n_rows, n_cols), x2d.dtype),
        grid_spec=pltpu.PrefetchScalarGridSpec(
            num_scalar_prefetch=0,
            grid=grid,
            in_specs=[pl.BlockSpec((tile_rows, n_cols), lambda i: (i, 0))],
            out_specs=pl.BlockSpec((tile_rows, n_cols), lambda i: (i, 0)),
        ),
        compiler_params=pltpu.CompilerParams(
            dimension_semantics=("parallel",),
            vmem_limit_bytes=32 * 1024 * 1024,
        ),
        cost_estimate=pl.CostEstimate(
            flops=0,
            transcendentals=0,
            bytes_accessed=2 * total * itemsize,  # one read + one write
        ),
    )(x2d)

    return out2d.reshape(orig_shape)


if __name__ == "__main__":
    key = jax.random.PRNGKey(0)
    # NCHW-style input consistent with a conv-network Identity block.
    x = jax.random.normal(key, (2, 4, 16, 16), dtype=jnp.float32)

    # Optimal path (no-op) -- trivially exact.
    y_opt = identity(x)
    assert y_opt is x

    # Pallas kernel path.
    y = identity_pallas(x)
    jax.block_until_ready(y)

    assert y.shape == x.shape, (y.shape, x.shape)
    assert y.dtype == x.dtype, (y.dtype, x.dtype)
    assert bool(jnp.all(y == x)), "Identity kernel output mismatch"

    print("KERNEL_OK")
</pallas_src>

<mosaic_0001>
module attributes {stable_mosaic.version = 11 : i64} {
  func.func @_identity_kernel(%arg0: i32, %arg1: memref<8x256xf32, #tpu.memory_space<vmem>>, %arg2: memref<8x256xf32, #tpu.memory_space<vmem>>) attributes {dimension_semantics = [#tpu.dimension_semantics<parallel>], iteration_bounds = array<i64: 1>, scalar_prefetch = 0 : i64, scratch_operands = 0 : i64, tpu.core_type = #tpu.core_type<tc>, window_params = [{transform_indices = @transform_0, window_bounds = array<i64: 8, 256>}, {transform_indices = @transform_1, window_bounds = array<i64: 8, 256>}]} {
    %c0 = arith.constant 0 : index
    %c0_0 = arith.constant 0 : index
    %0 = vector.load %arg1[%c0, %c0_0] : memref<8x256xf32, #tpu.memory_space<vmem>>, vector<8x256xf32>
    %c0_1 = arith.constant 0 : index
    %c0_2 = arith.constant 0 : index
    %1 = vector.load %arg2[%c0_1, %c0_2] : memref<8x256xf32, #tpu.memory_space<vmem>>, vector<8x256xf32>
    tpu.vector_store %arg2[%c0_1, %c0_2], %0 {strides = array<i32>} : memref<8x256xf32, #tpu.memory_space<vmem>>, vector<8x256xf32>,
    return
  }
  func.func @transform_0(%arg0: i32) -> (i32, i32) {
    %c0_i32 = arith.constant 0 : i32
    %c0_i32_0 = arith.constant 0 : i32
    return %arg0, %c0_i32 : i32, i32
  }
  func.func @transform_1(%arg0: i32) -> (i32, i32) {
    %c0_i32 = arith.constant 0 : i32
    %c0_i32_0 = arith.constant 0 : i32
    return %arg0, %c0_i32 : i32, i32
  }
}

</mosaic_0001>

<bundles_post_ra>
// kernel: tpu_custom_call.1
= control target key start
LH: loop header
LB: loop body
LE: loop exit
PB: predicated region body
PF: predicated region fallthrough
CT: control target
= control target key end

     0   :  { %6 = vsyncpa [#allocation3], 0  ;;  %s104_s0 = inlined_call_operand.hbm [shape: f32[8,256], index: 0, kind: input, shape index: {}]   ;;  %s105_s1 = inlined_call_operand.hbm [shape: f32[8,256], index: 1, kind: output, shape index: {}]  }
   0x1   :  { %7 = vsyncpa [#allocation4], 0  ;;  %s86_s6 = smov [#allocation2]  }
   0x2   :  { %s14_s7 = sshll.u32 %s86_s6, 4  ;;  %s15_s7 = int_to_ptr.vmem [resolvable:$true] %s14_s7 }
   0x3   :  { %s50_s8 = scalar_lea.vmem %s15_s7, 256  ;;  %p55_p1 = scmp.lt.s32.totalorder %s15_s7, %s15_s7 }
   0x4   :  { %p51_p0 = scmp.ne.s32.totalorder %s15_s7, %s50_s8  ;;  %p56_p2 = scmp.lt.s32.totalorder %s50_s8, %s50_s8 }
   0x6   :  { %p57_p3 = por %p56_p2, %p55_p1 }
   0x8   :  { %p58_p4 = pnand %p57_p3, %p51_p0 }
   0xa   :  { %61 = shalt.err (!%p58_p4)
}
   0xb   :  { %17 = dma.hbm_to_vmem [thread:$0]  %s104_s0, 256, %s15_s7, [#allocation3]  }
   0xc   :  { %82 = dma.done.wait [#allocation3], 256  }
   0xd   :  { %83 = vsyncadd [#allocation3], 4294967040  ;;  %s87_s11 = smov [#allocation5]   ;;  %v21_v0 = vld [vmem:[#allocation2] sm:$0xff]  ;;  %v22_v1 = vld [vmem:[#allocation2 + $0x8] sm:$0xff] }
   0xe   :  { %s31_s12 = sshll.u32 %s87_s11, 4  ;;  %23 = vst [vmem:[#allocation5] sm:$0xff] %v21_v0  ;;  %24 = vst [vmem:[#allocation5 + $0x8] sm:$0xff] %v22_v1  ;;  %s32_s12 = int_to_ptr.vmem [resolvable:$true] %s31_s12 }
   0xf   :  { %s62_s13 = scalar_lea.vmem %s32_s12, 256  ;;  %p67_p6 = scmp.lt.s32.totalorder %s32_s12, %s32_s12 }
  0x10   :  { %p63_p5 = scmp.ne.s32.totalorder %s32_s12, %s62_s13  ;;  %p68_p7 = scmp.lt.s32.totalorder %s62_s13, %s62_s13 }
  0x12   :  { %p69_p8 = por %p68_p7, %p67_p6 }
  0x14   :  { %p70_p9 = pnand %p69_p8, %p63_p5 }
  0x16   :  { %73 = shalt.err (!%p70_p9)
}
  0x17   :  { %34 = dma.vmem_to_hbm [thread:$0]  %s32_s12, 256, %s105_s1, [#allocation4]  }
  0x18   :  { %84 = dma.done.wait [#allocation4], 256  }
  0x19   :  { %85 = vsyncadd [#allocation4], 4294967040 }
  0x1a   :  { %38 = vsyncpa [#allocation3], 1 }
  0x1b   :  { %39 = vsyncpa [#allocation4], 1 }

</bundles_post_ra>
